<compile_context>
chip_gen: v6e
topology: v6e:2x2x1
jax: 0.10.0
libtpu: 0.0.40
codegen_flags: <defaults>
</compile_context>

<pallas_src>
import jax
import jax.numpy as jnp
from jax.experimental import pallas as pl
from jax.experimental.pallas import tpu as pltpu

_LANE = 128
_INV_SQRT2 = 0.7071067811865476


def _round_up(n, m):
    return ((n + m - 1) // m) * m


def mlp_kernel(x_ref, w1_ref, b1_ref, w2_ref, b2_ref, o_ref):
    # Layer 1: Linear — bf16 MXU operands, f32 accumulation.
    x = x_ref[...].astype(jnp.bfloat16)
    h = jnp.dot(x, w1_ref[...], preferred_element_type=jnp.float32)
    h = h + b1_ref[...]
    # Exact GELU (PyTorch nn.GELU default): 0.5 * x * (1 + erf(x / sqrt(2))), in f32.
    g = 0.5 * h * (1.0 + jax.lax.erf(h * jnp.float32(_INV_SQRT2)))
    # Layer 2: Linear — bf16 MXU operands, f32 accumulation.
    o = jnp.dot(g.astype(jnp.bfloat16), w2_ref[...],
                preferred_element_type=jnp.float32)
    o = o + b2_ref[...]
    o_ref[...] = o.astype(o_ref.dtype)


def prepare_params(w1, b1, w2, b2):
    """One-time parameter preparation (do at init time, NOT per forward call).

    PyTorch Linear layout in:  w1 [hidden, in_dim], b1 [hidden],
                               w2 [out_dim, hidden], b2 [out_dim].
    Returns weights transposed to [in, out] with hidden/output dims zero-padded
    to multiples of 128 (lane-dense), weights cast to bf16, biases as f32 rows.
    The zero padding is exact: padded hidden columns carry bias 0 so they are
    GELU(0) = 0, and padded w2 rows/columns contribute 0, so valid outputs are
    unchanged.
    """
    hidden, in_dim = w1.shape
    out_dim = w2.shape[0]
    hid_p = _round_up(hidden, _LANE)
    out_p = _round_up(out_dim, _LANE)

    w1t = jnp.zeros((in_dim, hid_p), jnp.bfloat16)
    w1t = w1t.at[:, :hidden].set(w1.T.astype(jnp.bfloat16))
    b1r = jnp.zeros((1, hid_p), jnp.float32)
    b1r = b1r.at[:, :hidden].set(b1.astype(jnp.float32))
    w2t = jnp.zeros((hid_p, out_p), jnp.bfloat16)
    w2t = w2t.at[:hidden, :out_dim].set(w2.T.astype(jnp.bfloat16))
    b2r = jnp.zeros((1, out_p), jnp.float32)
    b2r = b2r.at[:, :out_dim].set(b2.astype(jnp.float32))
    return {"w1t": w1t, "b1r": b1r, "w2t": w2t, "b2r": b2r, "out_dim": out_dim}


def mlp_layer(x, params, *, block_b=512):
    """x: [B, in_dim] float32. params: output of prepare_params.

    block_b: batch tile size (rows per grid step). 256-1024 keeps the pipeline
    near the HBM roofline at these layer widths while staying well inside the
    v7x 32 MiB scoped VMEM budget; tiny batches fall back to a single
    whole-batch tile.
    """
    w1t, b1r, w2t, b2r = params["w1t"], params["b1r"], params["w2t"], params["b2r"]
    out_dim = params["out_dim"]
    B, in_dim = x.shape
    hid_p = w1t.shape[1]
    out_p = w2t.shape[1]

    tb = min(block_b, B)              # whole-batch tile for tiny batches
    grid = (pl.cdiv(B, tb),)

    out_padded = pl.pallas_call(
        mlp_kernel,
        out_shape=jax.ShapeDtypeStruct((B, out_p), jnp.float32),
        grid=grid,
        in_specs=[
            pl.BlockSpec((tb, in_dim), lambda i: (i, 0)),      # streamed per tile
            pl.BlockSpec((in_dim, hid_p), lambda i: (0, 0)),   # VMEM-resident
            pl.BlockSpec((1, hid_p), lambda i: (0, 0)),        # VMEM-resident
            pl.BlockSpec((hid_p, out_p), lambda i: (0, 0)),    # VMEM-resident
            pl.BlockSpec((1, out_p), lambda i: (0, 0)),        # VMEM-resident
        ],
        out_specs=pl.BlockSpec((tb, out_p), lambda i: (i, 0)),
        compiler_params=pltpu.CompilerParams(
            dimension_semantics=("parallel",)),                # megacore-friendly
    )(x, w1t, b1r, w2t, b2r)

    if out_p == out_dim:
        return out_padded
    # Strip the lane padding back to the true output width.
    return out_padded[:, :out_dim]


def mlp_layer_ref_f32(x, w1, b1, w2, b2):
    """Pure-f32 reference matching the PyTorch module (exact erf GELU)."""
    h = x @ w1.T + b1
    g = 0.5 * h * (1.0 + jax.lax.erf(h / jnp.sqrt(2.0)))
    return g @ w2.T + b2


def mlp_layer_ref_bf16(x, w1, b1, w2, b2):
    """Reference at the kernel's precision (bf16 MXU operands, f32 accum/elementwise)."""
    h = jnp.dot(x.astype(jnp.bfloat16), w1.T.astype(jnp.bfloat16),
                preferred_element_type=jnp.float32) + b1
    g = 0.5 * h * (1.0 + jax.lax.erf(h * jnp.float32(_INV_SQRT2)))
    return jnp.dot(g.astype(jnp.bfloat16), w2.T.astype(jnp.bfloat16),
                   preferred_element_type=jnp.float32) + b2


if __name__ == "__main__":
    # Module hyperparams (small, consistent with the forward pass)
    seq_len, pred_len = 8, 4
    num_features, num_outputs = 4, 2
    hidden_size = 32
    batch = 64            # small, but enough to exercise batch tiling
    block_b = 32          # -> grid of 2 batch tiles (pipelined / megacore-shardable)

    in_dim = seq_len * num_features          # 32
    out_dim = pred_len * num_outputs         # 8

    key = jax.random.PRNGKey(0)
    kx, k1, k2, k3, k4 = jax.random.split(key, 5)

    x = jax.random.normal(kx, (batch, in_dim), dtype=jnp.float32)

    # Deterministic parameter init (PyTorch-Linear-style uniform bounds)
    bound1 = 1.0 / jnp.sqrt(in_dim)
    w1 = jax.random.uniform(k1, (hidden_size, in_dim), jnp.float32, -bound1, bound1)
    b1 = jax.random.uniform(k2, (hidden_size,), jnp.float32, -bound1, bound1)
    bound2 = 1.0 / jnp.sqrt(hidden_size)
    w2 = jax.random.uniform(k3, (out_dim, hidden_size), jnp.float32, -bound2, bound2)
    b2 = jax.random.uniform(k4, (out_dim,), jnp.float32, -bound2, bound2)

    # One-time param prep: transpose to [in,out], pad to lane-dense, cast to bf16.
    params = prepare_params(w1, b1, w2, b2)

    out = mlp_layer(x, params, block_b=block_b)
    out = jax.block_until_ready(out)
    assert out.shape == (batch, out_dim)

    # Check against a reference at the kernel's own precision (tight).
    ref_bf16 = mlp_layer_ref_bf16(x, w1, b1, w2, b2)
    assert jnp.allclose(out, ref_bf16, atol=1e-3, rtol=1e-3), "mismatch vs bf16 reference"

    # Check against the full-f32 PyTorch-semantics reference (loose tol for bf16 MXU inputs).
    ref_f32 = mlp_layer_ref_f32(x, w1, b1, w2, b2)
    assert jnp.allclose(out, ref_f32, atol=3e-2, rtol=3e-2), "mismatch vs f32 reference"

    print("KERNEL_OK")
</pallas_src>

<mosaic_0001>
module attributes {stable_mosaic.version = 11 : i64} {
  func.func @mlp_kernel(%arg0: i32, %arg1: memref<32x32xf32, #tpu.memory_space<vmem>>, %arg2: memref<32x128xbf16, #tpu.memory_space<vmem>>, %arg3: memref<1x128xf32, #tpu.memory_space<vmem>>, %arg4: memref<128x128xbf16, #tpu.memory_space<vmem>>, %arg5: memref<1x128xf32, #tpu.memory_space<vmem>>, %arg6: memref<32x128xf32, #tpu.memory_space<vmem>>) attributes {dimension_semantics = [#tpu.dimension_semantics<parallel>], iteration_bounds = array<i64: 2>, scalar_prefetch = 0 : i64, scratch_operands = 0 : i64, tpu.core_type = #tpu.core_type<tc>, window_params = [{transform_indices = @transform_0, window_bounds = array<i64: 32, 32>}, {pipeline_mode = #tpu.pipeline_mode<synchronous>, transform_indices = @transform_1, window_bounds = array<i64: 32, 128>}, {pipeline_mode = #tpu.pipeline_mode<synchronous>, transform_indices = @transform_2, window_bounds = array<i64: 1, 128>}, {pipeline_mode = #tpu.pipeline_mode<synchronous>, transform_indices = @transform_3, window_bounds = array<i64: 128, 128>}, {pipeline_mode = #tpu.pipeline_mode<synchronous>, transform_indices = @transform_4, window_bounds = array<i64: 1, 128>}, {transform_indices = @transform_5, window_bounds = array<i64: 32, 128>}]} {
    %c0 = arith.constant 0 : index
    %c0_0 = arith.constant 0 : index
    %0 = vector.load %arg1[%c0, %c0_0] : memref<32x32xf32, #tpu.memory_space<vmem>>, vector<32x32xf32>
    %1 = arith.truncf %0 : vector<32x32xf32> to vector<32x32xbf16>
    %c0_1 = arith.constant 0 : index
    %c0_2 = arith.constant 0 : index
    %2 = vector.load %arg2[%c0_1, %c0_2] : memref<32x128xbf16, #tpu.memory_space<vmem>>, vector<32x128xbf16>
    %cst = arith.constant dense<0.000000e+00> : vector<32x128xf32>
    %3 = tpu.matmul %1, %2, %cst {dimension_numbers = #tpu.dot_dimension_numbers<[1], [0], [0], [1], [0, 0, 1, 1], [], []>} : vector<32x32xbf16>, vector<32x128xbf16>, vector<32x128xf32> -> vector<32x128xf32>
    %c0_3 = arith.constant 0 : index
    %c0_4 = arith.constant 0 : index
    %4 = vector.load %arg3[%c0_3, %c0_4] : memref<1x128xf32, #tpu.memory_space<vmem>>, vector<1x128xf32>
    %5 = vector.broadcast %4 : vector<1x128xf32> to vector<32x128xf32>
    %6 = arith.addf %3, %5 : vector<32x128xf32>
    %cst_5 = arith.constant 5.000000e-01 : f32
    %7 = vector.broadcast %cst_5 : f32 to vector<32x128xf32>
    %8 = arith.mulf %7, %6 : vector<32x128xf32>
    %cst_6 = arith.constant 0.707106769 : f32
    %9 = vector.broadcast %cst_6 : f32 to vector<32x128xf32>
    %10 = arith.mulf %6, %9 : vector<32x128xf32>
    %11 = math.erf %10 : vector<32x128xf32>
    %cst_7 = arith.constant 1.000000e+00 : f32
    %12 = vector.broadcast %cst_7 : f32 to vector<32x128xf32>
    %13 = arith.addf %12, %11 : vector<32x128xf32>
    %14 = arith.mulf %8, %13 : vector<32x128xf32>
    %15 = arith.truncf %14 : vector<32x128xf32> to vector<32x128xbf16>
    %c0_8 = arith.constant 0 : index
    %c0_9 = arith.constant 0 : index
    %16 = vector.load %arg4[%c0_8, %c0_9] : memref<128x128xbf16, #tpu.memory_space<vmem>>, vector<128x128xbf16>
    %cst_10 = arith.constant dense<0.000000e+00> : vector<32x128xf32>
    %17 = tpu.matmul %15, %16, %cst_10 {dimension_numbers = #tpu.dot_dimension_numbers<[1], [0], [0], [1], [0, 0, 1, 1], [], []>} : vector<32x128xbf16>, vector<128x128xbf16>, vector<32x128xf32> -> vector<32x128xf32>
    %c0_11 = arith.constant 0 : index
    %c0_12 = arith.constant 0 : index
    %18 = vector.load %arg5[%c0_11, %c0_12] : memref<1x128xf32, #tpu.memory_space<vmem>>, vector<1x128xf32>
    %19 = vector.broadcast %18 : vector<1x128xf32> to vector<32x128xf32>
    %20 = arith.addf %17, %19 : vector<32x128xf32>
    %c0_13 = arith.constant 0 : index
    %c0_14 = arith.constant 0 : index
    %21 = vector.load %arg6[%c0_13, %c0_14] : memref<32x128xf32, #tpu.memory_space<vmem>>, vector<32x128xf32>
    tpu.vector_store %arg6[%c0_13, %c0_14], %20 {strides = array<i32>} : memref<32x128xf32, #tpu.memory_space<vmem>>, vector<32x128xf32>,
    return
  }
  func.func @transform_0(%arg0: i32) -> (i32, i32) {
    %c0_i32 = arith.constant 0 : i32
    %c0_i32_0 = arith.constant 0 : i32
    return %arg0, %c0_i32 : i32, i32
  }
  func.func @transform_1(%arg0: i32) -> (i32, i32) {
    %c0_i32 = arith.constant 0 : i32
    %c0_i32_0 = arith.constant 0 : i32
    %c0_i32_1 = arith.constant 0 : i32
    return %c0_i32, %c0_i32_0 : i32, i32
  }
  func.func @transform_2(%arg0: i32) -> (i32, i32) {
    %c0_i32 = arith.constant 0 : i32
    %c0_i32_0 = arith.constant 0 : i32
    %c0_i32_1 = arith.constant 0 : i32
    return %c0_i32, %c0_i32_0 : i32, i32
  }
  func.func @transform_3(%arg0: i32) -> (i32, i32) {
    %c0_i32 = arith.constant 0 : i32
    %c0_i32_0 = arith.constant 0 : i32
    %c0_i32_1 = arith.constant 0 : i32
    return %c0_i32, %c0_i32_0 : i32, i32
  }
  func.func @transform_4(%arg0: i32) -> (i32, i32) {
    %c0_i32 = arith.constant 0 : i32
    %c0_i32_0 = arith.constant 0 : i32
    %c0_i32_1 = arith.constant 0 : i32
    return %c0_i32, %c0_i32_0 : i32, i32
  }
  func.func @transform_5(%arg0: i32) -> (i32, i32) {
    %c0_i32 = arith.constant 0 : i32
    %c0_i32_0 = arith.constant 0 : i32
    return %arg0, %c0_i32 : i32, i32
  }
}

</mosaic_0001>

<bundles_post_ra>
// kernel: tpu_custom_call.1
= control target key start
LH: loop header
LB: loop body
LE: loop exit
PB: predicated region body
PF: predicated region fallthrough
CT: control target
= control target key end

     0   :  { %10 = vsyncpa [#allocation3], 0  ;;  %s894_s0 = inlined_call_operand.vmem [shape: f32[64,32], index: 0, kind: input, shape index: {}]   ;;  %s895_s1 = inlined_call_operand.vmem [shape: bf16[32,128], index: 1, kind: input, shape index: {}]   ;;  %s896_s2 = inlined_call_operand.vmem [shape: f32[1,128], index: 2, kind: input, shape index: {}]   ;;  %s897_s3 = inlined_call_operand.vmem [shape: bf16[128,128], index: 3, kind: input, shape index: {}]   ;;  %s898_s4 = inlined_call_operand.vmem [shape: f32[1,128], index: 4, kind: input, shape index: {}]   ;;  %s899_s5 = inlined_call_operand.hbm [shape: f32[64,128], index: 5, kind: output, shape index: {}]  }
   0x1   :  { %12 = vsyncpa [#allocation3 + $0x1], 0  ;;  %s757_s18 = smov 0   ;;  %s759_s19 = smov 0  }
   0x2   :  { %s761_s20 = smov 0   ;;  %s763_s21 = smov 0  }
   0x3 LB: > { %s778_s22 = sadd.s32 4294967295, %s722_s21   ;;  %s534_s23 = sadd.s32 4294967294, %s722_s21   ;;  %s722_s21 = sphi %s763_s21, %s905_s21   ;;  %s718_s20 = sphi %s761_s20, %s904_s20   ;;  %s714_s19 = sphi %s759_s19, %s903_s19   ;;  %s710_s18 = sphi %s757_s18, %s902_s18  }
   0x4   : > { %s782_s24 = sadd.s32 1, %s722_s21   ;;  %s135_s25 = sadd.s32 1, %s718_s20 }
   0x5   : > { %s132_s26 = ssub.s32 %s722_s21, %s782_s24  ;;  %p145_p0 = scmp.ne.s32.totalorder %s718_s20, %s714_s19 }
   0x6   : > { %p133_p1 = scmp.eq.s32.totalorder %s132_s26, 0  ;;  %p146_p2 = scmp.eq.s32.totalorder %s778_s22, 1 }
   0x7   : > { %p151_p3 = scmp.ne.s32.totalorder %s714_s19, %s710_s18  ;;  %p152_p4 = scmp.eq.s32.totalorder %s534_s23, 1 }
   0x8   : > { %s793_s27 = scalar_select %p133_p1, %s718_s20, %s135_s25  }
   0x9   : > { %p795_p5 = por %p146_p2, %p145_p0  ;;  %p799_p6 = por %p152_p4, %p151_p3 }
   0xa   : > { %p537_p7 = scmp.ge.s32.totalorder %s722_s21, 1  ;;  %p191_p8 = scmp.lt.s32.totalorder %s722_s21, 3 }
   0xc   : > { %p192_p9 = pnand %p537_p7, %p191_p8 }
   0xd   : > { %s539_s7 = sshll.u32 (!%p192_p9), %s778_s22, 2  ;;  %s216_s16 = sand.u32 (!%p192_p9), 1, %s714_s19  }
   0xe   : > { %195 = sbr.rel (%p192_p9) target bundleno = 467 (0x1d3), region = 40  ;;  %p220_p10 = scmp.lt.s32.totalorder (!%p192_p9), %s539_s7, 7 }
   0xf   : > { %s538_s17 = sshll.u32 (!%p192_p9), %s216_s16, 5  ;;  %s560_s6 = sshll.u32 (!%p192_p9), %s778_s22, 9 }
  0x10   : > { %s218_s26 = scalar_lea.vmem (!%p192_p9), [#allocation2], %s538_s17  ;;  %s852_s9 = scalar_lea.hbm (!%p192_p9), %s899_s5, %s560_s6 }
  0x11   : > { %s472_s30 = sshll.u32 (!%p192_p9), %s218_s26, 4  ;;  %s724_s11 = smov (!%p192_p9), [#allocation2]   ;;  %s847_s30 = int_to_ptr.vmem [resolvable:$true] %s472_s30 }
  0x12   : > { %s662_s22 = scalar_lea.vmem (!%p192_p9), %s847_s30, 512  ;;  %s666_s12 = sshll.u32 (!%p192_p9), %s724_s11, 4  ;;  %s667_s12 = int_to_ptr.vmem [resolvable:$false] %s666_s12 }
  0x13   : > { %v644_v0 = vld [vmem:[%s895_s1 + $0x8] sm:$0xff]   ;;  %v645_v1 = vld [vmem:[%s895_s1] sm:$0xff]   ;;  %s907_s7 = smov (!%p220_p10, %s539_s7), 7  ;;  %vm256_vm0 = vcmask 261120   ;;  %v646_v8 = vld [vmem:[%s897_s3 + $0x38] sm:$0xff]   ;;  %p663_p11 = scmp.ne.s32.totalorder %s847_s30, %s662_s22 }
  0x14   : > { %575 = vmatprep.subr.bf16.mxu0 %v644_v0  ;;  %s540_s10 = sshll.u32 %s907_s7, 3  ;;  %583 = vmatprep.subr.bf16.mxu1 %v646_v8  ;;  %v647_v9 = vld [vmem:[%s897_s3 + $0x30] sm:$0xff]   ;;  %v648_v10 = vld [vmem:[%s897_s3 + $0x28] sm:$0xff]   ;;  %v649_v11 = vld [vmem:[%s897_s3 + $0x20] sm:$0xff]   ;;  %p669_p0 = scmp.lt.s32.totalorder %s847_s30, %s667_s12 }
  0x15   : > { %576 = vmatpush3.bf16.msra.mxu0 %v644_v0  ;;  %s223_s13 = scalar_lea.vmem %s894_s0, %s540_s10  ;;  %584 = vmatpush3.bf16.msra.mxu1 %v646_v8  ;;  %v650_v12 = vld [vmem:[%s897_s3 + $0x18] sm:$0xff]   ;;  %v651_v13 = vld [vmem:[%s897_s3 + $0x10] sm:$0xff]   ;;  %v652_v14 = vld [vmem:[%s897_s3 + $0x8] sm:$0xff]   ;;  %s854_s10 = scalar_lea.sflag [#allocation3], %s216_s16 }
  0x16   : > { %577 = vmatprep.subr.bf16.mxu0 %v645_v1  ;;  %v227_v2 = vld [vmem:[%s223_s13] sm:$0xff]  ;;  %v228_v3 = vld [vmem:[%s223_s13 + $0x8] sm:$0xff]  ;;  %v229_v4 = vld [vmem:[%s223_s13 + $0x10] sm:$0xff]  ;;  %585 = vmatprep.subr.bf16.mxu1 %v647_v9  ;;  %p664_p12 = pnand %p663_p11, %p795_p5 }
  0x17   : > { %v231_v5 = vpack.c.bf16 %v228_v3, %v227_v2  ;;  %v230_v6 = vld [vmem:[%s223_s13 + $0x18] sm:$0xff]  ;;  %v653_v15 = vld [vmem:[%s897_s3] sm:$0xff]   ;;  %s668_s13 = scalar_lea.vmem %s667_s12, 1024 }
  0x18   : > { %v232_v7 = vpack.c.bf16 %v230_v6, %v229_v4  ;;  %v541_v16 = vld [vmem:[%s896_s2] ss:$0 sm:$0xff]  ;;  %p665_p13 = pneg %p664_p12  ;;  %p670_p1 = scmp.lt.s32.totalorder %s668_s13, %s662_s22 }
  0x19   : > { %578 = vmatpush3.bf16.msra.mxu0 %v645_v1  ;;  %579 = vmatprep.mubr.msk.bf16.mxu0 %vm256_vm0, %v231_v5  ;;  %v546_v47 = vld [vmem:[%s898_s4] ss:$0 sm:$0xff] }
  0x1a   : > { %586 = vmatpush3.bf16.msra.mxu1 %v647_v9  ;;  %p671_p2 = por %p670_p1, %p669_p0 }
  0x1b   : > { %587 = vmatprep.subr.bf16.mxu1 %v648_v10 }
  0x1c   : > { %580 = vmatmul.mubr.msk.bf16.vlgmr.msra.gmra.mxu0 %vm256_vm0, %v232_v7  ;;  %p672_p3 = pnand %p671_p2, %p665_p13 }
  0x1e   : > { %588 = vmatpush3.bf16.msra.mxu1 %v648_v10 }
  0x1f   : > { %589 = vmatprep.subr.bf16.mxu1 %v649_v11 }
  0x22   : > { %590 = vmatpush3.bf16.msra.mxu1 %v649_v11 }
  0x23   : > { %591 = vmatprep.subr.bf16.mxu1 %v650_v12 }
  0x26   : > { %592 = vmatpush3.bf16.msra.mxu1 %v650_v12 }
  0x27   : > { %593 = vmatprep.subr.bf16.mxu1 %v651_v13 }
  0x2a   : > { %594 = vmatpush3.bf16.msra.mxu1 %v651_v13 }
  0x2b   : > { %595 = vmatprep.subr.bf16.mxu1 %v652_v14 }
  0x2e   : > { %596 = vmatpush3.bf16.msra.mxu1 %v652_v14 }
  0x2f   : > { %597 = vmatprep.subr.bf16.mxu1 %v653_v15 }
  0x32   : > { %598 = vmatpush3.bf16.msra.mxu1 %v653_v15 }
  0xdc   : > { %v581_v17 = vpop.f32.mrf.mxu0 }
  0xdd   : > { %v306_v18 = vadd.f32 %v581_v17, %v541_v16 }
  0xde   : > { %v297_v19 = vpop.f32.mrf.mxu0 }
  0xdf   : > { %v298_v20 = vadd.f32 %v541_v16, %v297_v19  ;;  %v318_v21 = vmul.f32 0.70710677, %v306_v18  ;;  %v314_v40 = vmul.f32 0.5, %v306_v18 }
  0xe0   : > { %v582_v22 = vpop.f32.mrf.mxu0 }
  0xe1   : > { %v316_v23 = vmul.f32 0.70710677, %v298_v20  ;;  %v309_v24 = vadd.f32 %v582_v22, %v541_v16  ;;  %v312_v37 = vmul.f32 0.5, %v298_v20 }
  0xe2   : > { %v300_v25 = vpop.f32.mrf.mxu0 }
  0xe3   : > { %654 = verf.f32 %v316_v23  ;;  %v319_v26 = vmul.f32 0.70710677, %v309_v24  ;;  %v301_v27 = vadd.f32 %v541_v16, %v300_v25  ;;  %v315_v36 = vmul.f32 0.5, %v309_v24 }
  0xe4   : > { %656 = verf.f32 %v318_v21 }
  0xe5   : > { %658 = verf.f32 %v319_v26  ;;  %v317_v28 = vmul.f32 0.70710677, %v301_v27  ;;  %v313_v38 = vmul.f32 0.5, %v301_v27 }
  0xe7   : > { %660 = verf.f32 %v317_v28 }
  0xf0   : > { %v655_v29 = vpop.eup %654 }
  0xf1   : > { %v657_v30 = vpop.eup %656  ;;  %v324_v33 = vadd.f32 1.0, %v655_v29 }
  0xf2   : > { %v659_v31 = vpop.eup %658  ;;  %v326_v35 = vadd.f32 1.0, %v657_v30 }
  0xf3   : > { %v327_v32 = vadd.f32 1.0, %v659_v31  ;;  %v328_v42 = vmul.f32 %v324_v33, %v312_v37 }
  0xf4   : > { %v661_v34 = vpop.eup %660  ;;  %v330_v44 = vmul.f32 %v326_v35, %v314_v40 }
  0xf5   : > { %v325_v39 = vadd.f32 1.0, %v661_v34  ;;  %v331_v41 = vmul.f32 %v327_v32, %v315_v36 }
  0xf7   : > { %v329_v43 = vmul.f32 %v325_v39, %v313_v38  ;;  %v333_v46 = vpack.c.bf16 %v331_v41, %v330_v44 }
  0xf9   : > { %v332_v45 = vpack.c.bf16 %v329_v43, %v328_v42 }
  0xfb   : > { %599 = vmatprep.mubr.bf16.mxu1 %v332_v45 }
  0xfc   : > { %600 = vmatmul.mubr.bf16.vlgmr.msra.gmra.mxu1 %v333_v46 }
 0x1bc   : > { %v601_v48 = vpop.f32.mrf.mxu1 }
 0x1bd   : > { %v448_v49 = vadd.f32 %v601_v48, %v546_v47 }
 0x1be   : > { %v439_v50 = vpop.f32.mrf.mxu1 }
 0x1bf   : > { %456 = vst [vmem:[%s218_s26 + $0x10] sm:$0xff] %v448_v49  ;;  %v440_v51 = vadd.f32 %v546_v47, %v439_v50 }
 0x1c0   : > { %v602_v52 = vpop.f32.mrf.mxu1 }
 0x1c1   : > { %454 = vst [vmem:[%s218_s26] sm:$0xff] %v440_v51  ;;  %v451_v53 = vadd.f32 %v602_v52, %v546_v47 }
 0x1c2   : > { %v442_v54 = vpop.f32.mrf.mxu1 }
 0x1c3   : > { %457 = vst [vmem:[%s218_s26 + $0x18] sm:$0xff] %v451_v53  ;;  %v443_v55 = vadd.f32 %v546_v47, %v442_v54 }
 0x1c5   : > { %455 = vst [vmem:[%s218_s26 + $0x8] sm:$0xff] %v443_v55 }
 0x1c6   : > { %675 = shalt.err (!%p672_p3)
}
 0x1c7   : > { %s676_s14 = scalar_lea.hbm %s852_s9, 512  ;;  %s680_s17 = scalar_lea.hbm %s899_s5, 1024 }
 0x1c8   : > { %p677_p4 = scmp.ne.s32.totalorder %s852_s9, %s676_s14  ;;  %p681_p9 = scmp.lt.s32.totalorder %s852_s9, %s899_s5 }
 0x1c9   : > { %p682_p10 = scmp.lt.s32.totalorder %s680_s17, %s676_s14 }
 0x1ca   : > { %p678_p7 = pnand %p677_p4, %p795_p5 }
 0x1cb   : > { %p683_p11 = por %p682_p10, %p681_p9 }
 0x1cc   : > { %p679_p8 = pneg %p678_p7 }
 0x1ce   : > { %p684_p12 = pnand %p683_p11, %p679_p8 }
 0x1d0   : > { %687 = shalt.err (!%p684_p12)
}
 0x1d1   : > { %s725_s26 = smov 128   ;;  %s726_s6 = smov 8  }
 0x1d2   : > { %603 = dma.vmem_to_hbm [thread:$0]  (%p795_p5), %s847_s30, 512, %s852_s9, %s854_s10, %s725_s26, %s725_s26, %s726_s6  }
 0x1d3 PF: > { %p609_p13 = scmp.ge.s32.totalorder %s722_s21, 2  ;;  %s487_s7 = sand.u32 1, %s710_s18  }
 0x1d4   : > { %s488_s8 = scalar_lea.sflag [#allocation3], %s487_s7 }
 0x1d5   : > { %p606_p0 = pnand %p609_p13, %p799_p6 }
 0x1d7   : > { %p607_p1 = pneg %p606_p0 }
 0x1d9   : > { %705 = dma.done.wait (%p607_p1), %s488_s8, 512  }
 0x1da   : > { %707 = vsyncadd (%p607_p1), %s488_s8, 4294966784  ;;  %p15_p2 = scmp.ge.s32.totalorder %s782_s24, 4   ;;  %s902_s18 = smov %s714_s19 }
 0x1db   : > { %s903_s19 = smov %s718_s20  ;;  %s904_s20 = smov %s793_s27 }
 0x1dc   : > { %s905_s21 = smov %s782_s24  ;;  %17 = sbr.rel (!%p15_p2) target bundleno = 3 (0x3), region = 75 }
 0x1e1   :  { %493 = vsyncpa [#allocation3], 1 }
 0x1e2   :  { %495 = vsyncpa [#allocation3 + $0x1], 1 }

</bundles_post_ra>
